<compile_context>
chip_gen: v7x
topology: tpu7x:2x2x1
jax: 0.10.0
libtpu: 0.0.40
codegen_flags: <defaults>
</compile_context>

<pallas_src>
import math

import jax
import jax.numpy as jnp
from jax.experimental import pallas as pl
from jax.experimental.pallas import tpu as pltpu

_LANE = 128
_MAX_LANE_TILE = 16384          # lane-tile cap (64 KiB / row for f32)
_MAX_ROW_TILE = 4096            # row-tile cap
_TARGET_TILE_BYTES = 8 << 20    # ~8 MiB per (double-buffered) input tile


def _round_up(a: int, b: int) -> int:
    return ((a + b - 1) // b) * b


def _round_down(a: int, b: int) -> int:
    return (a // b) * b


def _lowest(dtype):
    if jnp.issubdtype(dtype, jnp.floating):
        return float("-inf")
    if jnp.issubdtype(dtype, jnp.integer):
        return int(jnp.iinfo(dtype).min)
    raise TypeError(f"unsupported dtype for max pooling: {dtype}")


def _fold_to(chunk, width: int):
    """Fold (rt, lt) -> (rt, width) via a pairwise elementwise max tree.

    Pure cross-vreg VPU work (lane-aligned static slices), no XLU reduce.
    """
    lt = chunk.shape[-1]
    if lt == width:
        return chunk
    parts = [chunk[:, i * width:(i + 1) * width] for i in range(lt // width)]
    while len(parts) > 1:
        nxt = [jnp.maximum(parts[i], parts[i + 1])
               for i in range(0, len(parts) - 1, 2)]
        if len(parts) % 2:
            nxt.append(parts[-1])
        parts = nxt
    return parts[0]


def _make_single_chunk_kernel(acc_lanes: int):
    """L fits in a single lane tile: no accumulator scratch needed."""
    def kernel(x_ref, o_ref):
        folded = _fold_to(x_ref[...], acc_lanes)
        o_ref[...] = jnp.max(folded, axis=-1, keepdims=True).astype(o_ref.dtype)
    return kernel


def _make_multi_chunk_kernel(rt: int, lt: int, acc_lanes: int, n_valid: int,
                             num_chunks: int, neg, need_mask: bool):
    last = num_chunks - 1
    tail_valid = n_valid - last * lt   # valid lanes in the last spatial chunk

    def accumulate(chunk, acc_ref):
        acc_ref[...] = jnp.maximum(acc_ref[...], _fold_to(chunk, acc_lanes))

    def kernel(x_ref, o_ref, acc_ref):
        k = pl.program_id(1)   # spatial-chunk (reduction) axis, iterates last

        @pl.when(k == 0)
        def _init():
            acc_ref[...] = jnp.full(acc_ref.shape, neg, acc_ref.dtype)

        if need_mask:
            # Only the last spatial chunk can be partial: keep the mask out of
            # the steady state (pure DMA + elementwise max per step).
            @pl.when(k != last)
            def _steady():
                accumulate(x_ref[...], acc_ref)

            @pl.when(k == last)
            def _tail():
                lane = jax.lax.broadcasted_iota(jnp.int32, (1, lt), 1)
                chunk = jnp.where(lane < tail_valid, x_ref[...],
                                  jnp.asarray(neg, dtype=x_ref.dtype))
                accumulate(chunk, acc_ref)
        else:
            accumulate(x_ref[...], acc_ref)

        @pl.when(k == last)
        def _finalize():
            # Single-vreg lane reduce (XLU), once per row tile.
            o_ref[...] = jnp.max(acc_ref[...], axis=-1,
                                 keepdims=True).astype(o_ref.dtype)

    return kernel


def global_max_pooling(x: jax.Array, keepdim: bool = False) -> jax.Array:
    """x: [B, C, *spatial] channels-first. Max over all spatial dims."""
    B, C = x.shape[0], x.shape[1]
    spatial = x.shape[2:]
    L = math.prod(spatial)
    R = B * C
    dtype = x.dtype
    itemsize = jnp.dtype(dtype).itemsize

    x2 = x.reshape(R, L)  # contiguous reshape: no HBM copy

    sub = max(8, 32 // itemsize)   # sublane packing: 8 f32 / 16 bf16 / 32 int8

    # --- lane (spatial) tile: multiple of 128, never exceeding the array dim ---
    if L <= _LANE:
        lt = L                      # "equal to full dim" is allowed
    else:
        lt_full = _round_down(L, _LANE)
        lt_budget = max(_LANE, _round_down(
            _TARGET_TILE_BYTES // (sub * itemsize), _LANE))
        lt = min(lt_full, lt_budget, _MAX_LANE_TILE)
    nk = pl.cdiv(L, lt)
    need_mask = (L % lt) != 0
    acc_lanes = _LANE if lt >= _LANE else lt   # lt is a 128-multiple whenever >128

    # --- row (B*C) tile: fill the byte budget, multiple of sublane packing ---
    if R <= sub:
        rt = R                      # full-dim block, any size allowed
    else:
        rows_budget = max(sub, _round_down(
            _TARGET_TILE_BYTES // (lt * itemsize), sub))
        rt = max(sub, min(_round_down(R, sub), rows_budget, _MAX_ROW_TILE))
    nr = pl.cdiv(R, rt)
    # v7x megacore: give the "parallel" row axis >= 2 tiles when possible.
    if nr == 1 and R >= 2 * sub:
        rt = _round_up(pl.cdiv(R, 2), sub)
        nr = pl.cdiv(R, rt)

    neg = _lowest(dtype)

    cost = pl.CostEstimate(flops=R * L, transcendentals=0,
                           bytes_accessed=R * L * itemsize + R * itemsize)

    # Double-buffered input tiles + accumulator + headroom; v5e's scoped
    # default (16 MiB) is too small for 2 x 8 MiB tiles, so raise explicitly.
    in_tile_bytes = rt * lt * itemsize
    acc_bytes = rt * acc_lanes * itemsize if nk > 1 else 0
    vmem_limit = int(min(max(2 * in_tile_bytes + acc_bytes + (4 << 20),
                             16 << 20), 40 << 20))

    if nk == 1:
        out = pl.pallas_call(
            _make_single_chunk_kernel(acc_lanes),
            out_shape=jax.ShapeDtypeStruct((R, 1), dtype),
            grid_spec=pltpu.PrefetchScalarGridSpec(
                num_scalar_prefetch=0,
                grid=(nr,),
                in_specs=[pl.BlockSpec((rt, lt), lambda r: (r, 0))],
                out_specs=pl.BlockSpec((rt, 1), lambda r: (r, 0)),
            ),
            compiler_params=pltpu.CompilerParams(
                dimension_semantics=("parallel",),
                vmem_limit_bytes=vmem_limit),
            cost_estimate=cost,
        )(x2)
    else:
        out = pl.pallas_call(
            _make_multi_chunk_kernel(rt, lt, acc_lanes, L, nk, neg, need_mask),
            out_shape=jax.ShapeDtypeStruct((R, 1), dtype),
            grid_spec=pltpu.PrefetchScalarGridSpec(
                num_scalar_prefetch=0,
                grid=(nr, nk),
                in_specs=[pl.BlockSpec((rt, lt), lambda r, k: (r, k))],
                out_specs=pl.BlockSpec((rt, 1), lambda r, k: (r, 0)),
                scratch_shapes=[pltpu.VMEM((rt, acc_lanes), dtype)],
            ),
            compiler_params=pltpu.CompilerParams(
                dimension_semantics=("parallel", "arbitrary"),
                vmem_limit_bytes=vmem_limit),
            cost_estimate=cost,
        )(x2)

    out = out.reshape(B, C)
    if keepdim:
        out = out.reshape((B, C) + (1,) * len(spatial))
    return out


def global_max_pooling_2d(x: jax.Array, keepdim: bool = False) -> jax.Array:
    """Convenience wrapper matching GlobalMaxPooling(spatial_dims=2)."""
    return global_max_pooling(x, keepdim=keepdim)


if __name__ == "__main__":
    root = jax.random.PRNGKey(0)
    k0, k1, k2 = jax.random.split(root, 3)

    # GlobalMaxPooling(spatial_dims=2, keepdim=False): NCHW input.
    B, C, H, W = 2, 4, 16, 16
    x = jax.random.normal(k0, (B, C, H, W), dtype=jnp.float32)
    y = jax.block_until_ready(global_max_pooling_2d(x, keepdim=False))
    ref = jnp.max(x, axis=(2, 3))
    assert y.shape == (B, C), y.shape
    assert jnp.allclose(y, ref), "mismatch vs reference (aligned shape)"

    # Ragged NCHW + keepdim=True: partial row tile + masked tail spatial chunk.
    x2 = jax.random.normal(k1, (2, 3, 13, 11), dtype=jnp.float32)
    y2 = jax.block_until_ready(global_max_pooling_2d(x2, keepdim=True))
    ref2 = jnp.max(x2, axis=(2, 3), keepdims=True)
    assert y2.shape == (2, 3, 1, 1), y2.shape
    assert jnp.allclose(y2, ref2), "mismatch vs reference (ragged shape)"

    # spatial_dims=1 (NCL): multi-chunk reduction + in-chunk lane fold + mask.
    x3 = jax.random.normal(k2, (2, 4, 300), dtype=jnp.float32)
    y3 = jax.block_until_ready(global_max_pooling(x3, keepdim=False))
    ref3 = jnp.max(x3, axis=2)
    assert y3.shape == (2, 4), y3.shape
    assert jnp.allclose(y3, ref3), "mismatch vs reference (1-D spatial)"

    print("KERNEL_OK")
</pallas_src>

<mosaic_0001>
module attributes {stable_mosaic.version = 11 : i64} {
  func.func @kernel(%arg0: i32, %arg1: memref<8x256xf32, #tpu.memory_space<vmem>>, %arg2: memref<8x1xf32, #tpu.memory_space<vmem>>) attributes {dimension_semantics = [#tpu.dimension_semantics<parallel>], iteration_bounds = array<i64: 1>, scalar_prefetch = 0 : i64, scratch_operands = 0 : i64, tpu.core_type = #tpu.core_type<tc>, window_params = [{transform_indices = @transform_0, window_bounds = array<i64: 8, 256>}, {transform_indices = @transform_1, window_bounds = array<i64: 8, 1>}]} {
    %c0 = arith.constant 0 : index
    %c0_0 = arith.constant 0 : index
    %0 = vector.load %arg1[%c0, %c0_0] : memref<8x256xf32, #tpu.memory_space<vmem>>, vector<8x256xf32>
    %1 = vector.extract_strided_slice %0 {offsets = [0, 0], sizes = [8, 128], strides = [1, 1]} : vector<8x256xf32> to vector<8x128xf32>
    %2 = vector.extract_strided_slice %0 {offsets = [0, 128], sizes = [8, 128], strides = [1, 1]} : vector<8x256xf32> to vector<8x128xf32>
    %3 = arith.maximumf %1, %2 : vector<8x128xf32>
    %cst = arith.constant dense<0xFF800000> : vector<8xf32>
    %4 = vector.multi_reduction <maximumf>, %3, %cst [1] : vector<8x128xf32> to vector<8xf32>
    %5 = vector.shape_cast %4 : vector<8xf32> to vector<8x1xf32>
    %c0_1 = arith.constant 0 : index
    %c0_2 = arith.constant 0 : index
    %6 = vector.load %arg2[%c0_1, %c0_2] : memref<8x1xf32, #tpu.memory_space<vmem>>, vector<8x1xf32>
    tpu.vector_store %arg2[%c0_1, %c0_2], %5 {strides = array<i32>} : memref<8x1xf32, #tpu.memory_space<vmem>>, vector<8x1xf32>,
    return
  }
  func.func @transform_0(%arg0: i32) -> (i32, i32) {
    %c0_i32 = arith.constant 0 : i32
    %c0_i32_0 = arith.constant 0 : i32
    return %arg0, %c0_i32 : i32, i32
  }
  func.func @transform_1(%arg0: i32) -> (i32, i32) {
    %c0_i32 = arith.constant 0 : i32
    %c0_i32_0 = arith.constant 0 : i32
    return %arg0, %c0_i32 : i32, i32
  }
}

</mosaic_0001>

<bundles_post_ra>
// kernel: tpu_custom_call.1
= control target key start
LH: loop header
LB: loop body
LE: loop exit
PB: predicated region body
PF: predicated region fallthrough
CT: control target
= control target key end

     0   :  { %6 = vsyncpa [#allocation3], 0  ;;  %s57_s6 = smov [#allocation2]   ;;  %s83_s0 = inlined_call_operand.hbm [shape: f32[8,256], index: 0, kind: input, shape index: {}]   ;;  %s84_s1 = inlined_call_operand.vmem [shape: f32[8,1], index: 1, kind: output, shape index: {}]  }
   0x1   :  { %s13_s7 = sshll.u32 %s57_s6, 4  ;;  %s33_s10 = scalar_lea.hbm %s83_s0, 256  ;;  %s14_s7 = int_to_ptr.vmem [resolvable:$true] %s13_s7 }
   0x2   :  { %p34_p0 = scmp.ne.s32.totalorder %s83_s0, %s33_s10  ;;  %p37_p1 = scmp.lt.u32.totalorder %s33_s10, %s83_s0 }
   0x4   :  { %p39_p2 = pnand %p37_p1, %p34_p0 }
   0x6   :  { %42 = shalt.err (!%p39_p2)
}
   0x7   :  { %s43_s15 = scalar_lea.vmem %s14_s7, 256  ;;  %p48_p4 = scmp.lt.s32.totalorder %s14_s7, %s14_s7 }
   0x8   :  { %p44_p3 = scmp.ne.s32.totalorder %s14_s7, %s43_s15  ;;  %p49_p5 = scmp.lt.s32.totalorder %s43_s15, %s43_s15 }
   0xa   :  { %p50_p6 = por %p49_p5, %p48_p4 }
   0xc   :  { %p51_p7 = pnand %p50_p6, %p44_p3 }
   0xe   :  { %54 = shalt.err (!%p51_p7)
}
   0xf   :  { %16 = dma.hbm_to_vmem [thread:$0]  %s83_s0, 256, %s14_s7, [#allocation3]  }
  0x10   :  { %55 = dma.done.wait [#allocation3], 256  }
  0x11   :  { %56 = vsyncadd [#allocation3], 4294967040  ;;  %v20_v0 = vld [vmem:[#allocation2] sm:$0xff]  ;;  %v21_v1 = vld [vmem:[#allocation2 + $0x8] sm:$0xff]  ;;  %vm25_vm0 = vcmask 7168  }
  0x12   :  { %v22_v2 = vmax.f32 %v20_v0, %v21_v1 }
  0x14   :  { %23 = vmax.xlane.f32.xlu0 %v22_v2 }
  0xa1   :  { %v24_v3 = vpop.xlane.xlu0 %23 }
  0xa2   :  { %26 = vst.msk [vmem:[%s84_s1] sm:$0xff] %vm25_vm0, %v24_v3 }
  0xa3   :  { %31 = vsyncpa [#allocation3], 1 }

</bundles_post_ra>
